<compile_context>
chip_gen: v7x
topology: tpu7x:2x2x1
jax: 0.10.0
libtpu: 0.0.40
codegen_flags: <defaults>
</compile_context>

<pallas_src>
import jax
import jax.numpy as jnp
from jax.experimental import pallas as pl
from jax.experimental.pallas import tpu as pltpu

INPUT_DIM = 14      # fixed by the module
OUT_DIM = 14        # fixed by the module
NUM_LAYERS = 1      # args.num_layers (only the last layer is ever used in forward)
HIDDEN_DIM = 32     # args.hidden_dim (unused when num_layers == 1)

LANE = 128          # TPU lane width
SMALL_BATCH_THRESHOLD = 2048   # below this, a fused XLA matmul beats the Pallas launch


def _round_up(n, m):
    return ((n + m - 1) // m) * m


def _mlp_kernel(w_ref, b_ref, x_ref, o_ref):
    """One batch tile: o = relu(W @ x + b), batch on the lane axis.

    w_ref: (out_f, in_f)   resident across the grid
    b_ref: (out_f, 1)      resident across the grid
    x_ref: (in_f, TB)      current batch tile (lane-dense)
    o_ref: (out_f, TB)     current output tile (lane-dense, unmasked stores)
    """
    y = jnp.dot(w_ref[...], x_ref[...], preferred_element_type=jnp.float32)
    o_ref[...] = jnp.maximum(y + b_ref[...], 0.0).astype(o_ref.dtype)


def mlp_forward_t(xT, weight, bias, *, block_b=32768):
    """Lane-dense core: relu(W @ xT + b) with batch on the lane axis.

    xT:     (in_f, B) float32   (batch already on the lane axis — no transposes here)
    weight: (out_f, in_f) PyTorch-style
    bias:   (out_f,)
    returns (out_f, B)
    """
    in_f, B = xT.shape
    out_f = weight.shape[0]

    # Lane tile: multiple of 128, capped so the grid keeps >=2 steps when B allows it
    # (lets dimension_semantics=("parallel",) shard batch tiles across v7x's 2 TCs).
    tb = min(block_b, _round_up(pl.cdiv(B, 2), LANE))
    tb = max(_round_up(tb, LANE), LANE)
    grid = (pl.cdiv(B, tb),)   # ragged last block handled by Pallas (masked OOB stores)

    b2 = bias.reshape(out_f, 1)   # broadcasts over the lane axis inside the kernel

    return pl.pallas_call(
        _mlp_kernel,
        out_shape=jax.ShapeDtypeStruct((out_f, B), xT.dtype),
        grid=grid,
        in_specs=[
            pl.BlockSpec((out_f, in_f), lambda i: (0, 0)),   # weight: stays resident
            pl.BlockSpec((out_f, 1), lambda i: (0, 0)),      # bias:   stays resident
            pl.BlockSpec((in_f, tb), lambda i: (0, i)),      # x tile: batch-tiled
        ],
        out_specs=pl.BlockSpec((out_f, tb), lambda i: (0, i)),
        compiler_params=pltpu.CompilerParams(
            dimension_semantics=("parallel",),               # shard batch tiles on v7x
        ),
    )(weight, b2, xT)


def mlp_forward(x, weight, bias, *, block_b=32768, use_xla_fast_path=True):
    """PyTorch-contract wrapper: relu(Linear(x)).

    x:      (B, in_f) float32
    weight: (out_f, in_f)
    bias:   (out_f,)
    returns (B, out_f)

    For small batches the whole problem is ~100 KiB of HBM traffic, so the transpose +
    Pallas-launch chain is pure overhead; a single fused XLA matmul wins outright.
    Large-batch callers that can produce/consume the (features, batch) layout directly
    should call mlp_forward_t and avoid the two wrapper transposes entirely.
    """
    B = x.shape[0]
    if use_xla_fast_path and B < SMALL_BATCH_THRESHOLD:
        return jnp.maximum(x @ weight.T + bias, 0.0)
    yT = mlp_forward_t(x.T, weight, bias, block_b=block_b)
    return yT.T


def init_params(key):
    """Deterministic init mimicking nn.Linear default (uniform +/- 1/sqrt(fan_in)).

    Creates NUM_LAYERS layers like __init__ does, but only the last one is used by the
    (buggy) forward -- we return just that last layer's params.
    """
    params = []
    for layer in range(NUM_LAYERS):
        in_features = INPUT_DIM if layer == 0 else HIDDEN_DIM
        out_features = OUT_DIM
        key, kw, kb = jax.random.split(key, 3)
        bound = 1.0 / jnp.sqrt(jnp.float32(in_features))
        w = jax.random.uniform(kw, (out_features, in_features), jnp.float32,
                               minval=-bound, maxval=bound)
        b = jax.random.uniform(kb, (out_features,), jnp.float32,
                               minval=-bound, maxval=bound)
        params.append((w, b))
    return params[-1]


if __name__ == "__main__":
    key = jax.random.PRNGKey(0)
    key, kx = jax.random.split(key)

    weight, bias = init_params(key)

    # Small shape consistent with the module: batch=2, features=14.
    # Force the Pallas path so the kernel itself is exercised at this size.
    x_small = jax.random.normal(kx, (2, INPUT_DIM), jnp.float32)
    ref_small = jnp.maximum(x_small @ weight.T + bias, 0.0)
    out_small = jax.block_until_ready(
        mlp_forward(x_small, weight, bias, use_xla_fast_path=False))
    assert out_small.shape == (2, OUT_DIM)
    assert jnp.allclose(out_small, ref_small, atol=1e-5, rtol=1e-5)

    # Default path at small batch uses the fused-XLA fast path; same semantics.
    out_small_fast = jax.block_until_ready(mlp_forward(x_small, weight, bias))
    assert jnp.allclose(out_small_fast, ref_small, atol=1e-5, rtol=1e-5)

    # Ragged larger batch exercises the multi-block pipelined path with a masked last
    # block (B=1000, tb=256 -> grid of 4, last block ragged) and no explicit pad/slice.
    key, kx2 = jax.random.split(key)
    x_big = jax.random.normal(kx2, (1000, INPUT_DIM), jnp.float32)
    ref_big = jnp.maximum(x_big @ weight.T + bias, 0.0)
    out_big = jax.block_until_ready(
        mlp_forward(x_big, weight, bias, block_b=256, use_xla_fast_path=False))
    assert out_big.shape == (1000, OUT_DIM)
    assert jnp.allclose(out_big, ref_big, atol=1e-5, rtol=1e-5)

    # Lane-dense contract (no wrapper transposes) — the layout large-B callers should use.
    yT_big = jax.block_until_ready(mlp_forward_t(x_big.T, weight, bias, block_b=256))
    assert yT_big.shape == (OUT_DIM, 1000)
    assert jnp.allclose(yT_big.T, ref_big, atol=1e-5, rtol=1e-5)

    print("KERNEL_OK")
</pallas_src>

<mosaic_0001>
module attributes {stable_mosaic.version = 11 : i64} {
  func.func @_mlp_kernel(%arg0: i32, %arg1: memref<14x14xf32, #tpu.memory_space<vmem>>, %arg2: memref<14x1xf32, #tpu.memory_space<vmem>>, %arg3: memref<14x128xf32, #tpu.memory_space<vmem>>, %arg4: memref<14x128xf32, #tpu.memory_space<vmem>>) attributes {dimension_semantics = [#tpu.dimension_semantics<parallel>], iteration_bounds = array<i64: 1>, scalar_prefetch = 0 : i64, scratch_operands = 0 : i64, tpu.core_type = #tpu.core_type<tc>, window_params = [{pipeline_mode = #tpu.pipeline_mode<synchronous>, transform_indices = @transform_0, window_bounds = array<i64: 14, 14>}, {pipeline_mode = #tpu.pipeline_mode<synchronous>, transform_indices = @transform_1, window_bounds = array<i64: 14, 1>}, {transform_indices = @transform_2, window_bounds = array<i64: 14, 128>}, {transform_indices = @transform_3, window_bounds = array<i64: 14, 128>}]} {
    %c0 = arith.constant 0 : index
    %c0_0 = arith.constant 0 : index
    %0 = vector.load %arg1[%c0, %c0_0] : memref<14x14xf32, #tpu.memory_space<vmem>>, vector<14x14xf32>
    %c0_1 = arith.constant 0 : index
    %c0_2 = arith.constant 0 : index
    %1 = vector.load %arg3[%c0_1, %c0_2] : memref<14x128xf32, #tpu.memory_space<vmem>>, vector<14x128xf32>
    %cst = arith.constant dense<0.000000e+00> : vector<14x128xf32>
    %2 = tpu.matmul %0, %1, %cst {dimension_numbers = #tpu.dot_dimension_numbers<[1], [0], [0], [1], [0, 0, 1, 1], [], []>} : vector<14x14xf32>, vector<14x128xf32>, vector<14x128xf32> -> vector<14x128xf32>
    %c0_3 = arith.constant 0 : index
    %c0_4 = arith.constant 0 : index
    %3 = vector.load %arg2[%c0_3, %c0_4] : memref<14x1xf32, #tpu.memory_space<vmem>>, vector<14x1xf32>
    %4 = vector.broadcast %3 : vector<14x1xf32> to vector<14x128xf32>
    %5 = arith.addf %2, %4 : vector<14x128xf32>
    %cst_5 = arith.constant 0.000000e+00 : f32
    %6 = vector.broadcast %cst_5 : f32 to vector<14x128xf32>
    %7 = arith.maximumf %5, %6 : vector<14x128xf32>
    %c0_6 = arith.constant 0 : index
    %c0_7 = arith.constant 0 : index
    %8 = vector.load %arg4[%c0_6, %c0_7] : memref<14x128xf32, #tpu.memory_space<vmem>>, vector<14x128xf32>
    tpu.vector_store %arg4[%c0_6, %c0_7], %7 {strides = array<i32>} : memref<14x128xf32, #tpu.memory_space<vmem>>, vector<14x128xf32>,
    return
  }
  func.func @transform_0(%arg0: i32) -> (i32, i32) {
    %c0_i32 = arith.constant 0 : i32
    %c0_i32_0 = arith.constant 0 : i32
    %c0_i32_1 = arith.constant 0 : i32
    return %c0_i32, %c0_i32_0 : i32, i32
  }
  func.func @transform_1(%arg0: i32) -> (i32, i32) {
    %c0_i32 = arith.constant 0 : i32
    %c0_i32_0 = arith.constant 0 : i32
    %c0_i32_1 = arith.constant 0 : i32
    return %c0_i32, %c0_i32_0 : i32, i32
  }
  func.func @transform_2(%arg0: i32) -> (i32, i32) {
    %c0_i32 = arith.constant 0 : i32
    %c0_i32_0 = arith.constant 0 : i32
    return %c0_i32, %arg0 : i32, i32
  }
  func.func @transform_3(%arg0: i32) -> (i32, i32) {
    %c0_i32 = arith.constant 0 : i32
    %c0_i32_0 = arith.constant 0 : i32
    return %c0_i32, %arg0 : i32, i32
  }
}

</mosaic_0001>

<bundles_post_ra>
// kernel: tpu_custom_call.1
= control target key start
LH: loop header
LB: loop body
LE: loop exit
PB: predicated region body
PF: predicated region fallthrough
CT: control target
= control target key end

     0   :  { %vm37_vm0 = vcmask 1045504   ;;  %vm30_vm1 = vcmask 113664   ;;  %vm147_vm2 = vmmov 1   ;;  %v148_v2 = vmov 0   ;;  %s195_s2 = inlined_call_operand.vmem [shape: f32[14,2], index: 2, kind: input, shape index: {}]   ;;  %s196_s0 = inlined_call_operand.vmem [shape: f32[14,14], index: 0, kind: input, shape index: {}]   ;;  %s197_s1 = inlined_call_operand.vmem [shape: f32[14,1], index: 1, kind: input, shape index: {}]   ;;  %s198_s3 = inlined_call_operand.vmem [shape: f32[14,2], index: 3, kind: output, shape index: {}]  }
   0x1   :  { %v16_v0 = vld [vmem:[%s195_s2] sm:$0xff]  ;;  %v17_v1 = vld [vmem:[%s195_s2 + $0x8] sm:$0x3f]  ;;  %vm139_vm3 = vmpackc.low %vm37_vm0, %vm147_vm2  ;;  %146 = vset.pattern.permute.xlu0 %v148_v2 }
   0x2   :  { %v138_v3 = vpack.c.bf16 %v17_v1, %v16_v0  ;;  %v14_v4 = vld [vmem:[%s196_s0] sm:$0xff]  ;;  %v19_v6 = vld [vmem:[%s197_s1 + $0x8] sm:$0x3f] }
   0x3   :  { %v18_v5 = vld [vmem:[%s197_s1] sm:$0xff]  ;;  %135 = vmatprep.mubr.msk.f32.mxu0 %vm30_vm1, %v14_v4  ;;  %v15_v7 = vld [vmem:[%s196_s0 + $0x8] sm:$0x3f] }
   0x4   :  { %22 = vperm.xlu0 %146, %v18_v5   ;;  %140 = vmatprep.subr.msk.bf16.mxu0 %vm139_vm3, %v138_v3 }
   0x5   :  { %143 = vmatpush3.bf16.msk.msra.mxu0 %vm139_vm3, %v138_v3 }
   0x8   :  { %27 = vperm.xlu0 %146, %v19_v6   ;;  %136 = vmatmul.mubr.msk.f32.vlgmr.msra.gmra.mrb[0].mxu0 %vm30_vm1, %v15_v7 }
  0x83   :  { %v23_v8 = vpop.permute.xlu0 %22 }
  0x87   :  { %v28_v9 = vpop.permute.xlu0 %27 }
  0xdb   :  { %v137_v10 = vpop.f32.mrb[0].mxu0 }
  0xdc   :  { %v113_v11 = vadd.f32 %v137_v10, %v28_v9  ;;  %v107_v12 = vpop.f32.mrb[1].mxu0 }
  0xdd   :  { %v108_v13 = vadd.f32 %v107_v12, %v23_v8 }
  0xde   :  { %v117_v14 = vmax.f32 %v113_v11, 0.0 }
  0xdf   :  { %v116_v15 = vmax.f32 %v108_v13, 0.0 }
  0xe0   :  { %119 = vst [vmem:[%s198_s3 + $0x8] sm:$0x3f] %v117_v14 }
  0xe1   :  { %118 = vst [vmem:[%s198_s3] sm:$0xff] %v116_v15 }

</bundles_post_ra>
